<compile_context>
chip_gen: v5e
topology: v5e:2x2
jax: 0.10.0
libtpu: 0.0.40
codegen_flags: <defaults>
</compile_context>

<pallas_src>
import math

import jax
import jax.numpy as jnp
import numpy as np
from jax import lax
from jax.experimental import pallas as pl
from jax.experimental.pallas import tpu as pltpu


def _self_attention_kernel(x_ref, wqkv_ref, bqkv_ref, o_ref):
    # x_ref block: (Bt, S, D); wqkv_ref: (D, 3D); bqkv_ref: (1, 3D).
    Bt, S, D = x_ref.shape
    inv_sqrt_d = jnp.float32(1.0 / math.sqrt(D))

    # Fused QKV projection: one MXU matmul with M = Bt*S, N = 3D.
    x2d = x_ref[...].reshape(Bt * S, D)
    qkv = jnp.dot(x2d, wqkv_ref[...], preferred_element_type=jnp.float32)
    qkv = qkv + bqkv_ref[...].astype(jnp.float32)
    qkv = qkv.reshape(Bt, S, 3 * D)

    q = qkv[:, :, 0 * D:1 * D]          # (Bt, S, D) f32
    k = qkv[:, :, 1 * D:2 * D]          # (Bt, S, D) f32
    v = qkv[:, :, 2 * D:3 * D]          # (Bt, S, D) f32

    # scores[b, i, j] = sum_d q[b,i,d] * k[b,j,d]  (no explicit k transpose).
    scores = lax.dot_general(
        q, k, (((2,), (2,)), ((0,), (0,))),
        preferred_element_type=jnp.float32) * inv_sqrt_d         # (Bt, S, S)

    # Numerically-stable softmax over the last axis.
    scores = scores - jnp.max(scores, axis=-1, keepdims=True)
    e = jnp.exp(scores)
    denom = jnp.sum(e, axis=-1, keepdims=True)
    w = e * pl.reciprocal(denom, approx=True)                    # EUP slot

    # out[b, i, d] = sum_j w[b,i,j] * v[b,j,d]
    out = lax.dot_general(
        w, v, (((2,), (1,)), ((0,), (0,))),
        preferred_element_type=jnp.float32)                      # (Bt, S, D)

    o_ref[...] = out.astype(o_ref.dtype)


def _pick_batch_tile(B, S, max_rows=1024):
    """Largest divisor of B such that the projection has <= max_rows rows."""
    for cand in range(B, 0, -1):
        if B % cand == 0 and cand * S <= max_rows:
            return cand
    return 1


def self_attention_pallas(x, wq, wk, wv, bq, bk, bv, *, batch_tile=None):
    """x: (B, S, D); wq/wk/wv: (D, D) in PyTorch (out, in) layout; b*: (1, D) or (D,)."""
    B, S, D = x.shape

    # Weight prep (outside the kernel, done once): pre-transpose to (in, out)
    # layout and fuse Q|K|V along the output axis.
    wqkv = jnp.concatenate([wq.T, wk.T, wv.T], axis=1)                  # (D, 3D)
    bqkv = jnp.concatenate(
        [bq.reshape(1, D), bk.reshape(1, D), bv.reshape(1, D)], axis=1)  # (1, 3D)

    if batch_tile is None:
        batch_tile = _pick_batch_tile(B, S)
    assert B % batch_tile == 0

    grid = (B // batch_tile,)

    x_spec = pl.BlockSpec((batch_tile, S, D), lambda b: (b, 0, 0))
    o_spec = pl.BlockSpec((batch_tile, S, D), lambda b: (b, 0, 0))
    w_spec = pl.BlockSpec((D, 3 * D), lambda b: (0, 0))
    b_spec = pl.BlockSpec((1, 3 * D), lambda b: (0, 0))

    return pl.pallas_call(
        _self_attention_kernel,
        out_shape=jax.ShapeDtypeStruct((B, S, D), x.dtype),
        grid_spec=pltpu.PrefetchScalarGridSpec(
            num_scalar_prefetch=0,
            grid=grid,
            in_specs=[x_spec, w_spec, b_spec],
            out_specs=o_spec,
        ),
        compiler_params=pltpu.CompilerParams(
            dimension_semantics=("parallel",)),
    )(x, wqkv, bqkv)


def self_attention_ref(x, wq, wk, wv, bq, bk, bv):
    """Plain-JAX reference mirroring the PyTorch forward."""
    dim = x.shape[-1]
    q = x @ wq.T + bq.reshape(1, -1)
    k = x @ wk.T + bk.reshape(1, -1)
    v = x @ wv.T + bv.reshape(1, -1)
    scores = jnp.einsum("bqd,bkd->bqk", q, k) / math.sqrt(dim)
    w = jax.nn.softmax(scores, axis=-1)
    return jnp.einsum("bqk,bkd->bqd", w, v)


if __name__ == "__main__":
    B, S, D = 2, 8, 32  # batch, seq, hidden (dim)

    key = jax.random.PRNGKey(0)
    kx, kq, kk, kv, kbq, kbk, kbv = jax.random.split(key, 7)

    # nn.Linear default init range U(-1/sqrt(dim), 1/sqrt(dim)).
    bound = 1.0 / math.sqrt(D)
    x = jax.random.normal(kx, (B, S, D), dtype=jnp.float32)
    wq = jax.random.uniform(kq, (D, D), jnp.float32, -bound, bound)
    wk = jax.random.uniform(kk, (D, D), jnp.float32, -bound, bound)
    wv = jax.random.uniform(kv, (D, D), jnp.float32, -bound, bound)
    bq = jax.random.uniform(kbq, (1, D), jnp.float32, -bound, bound)
    bk = jax.random.uniform(kbk, (1, D), jnp.float32, -bound, bound)
    bv = jax.random.uniform(kbv, (1, D), jnp.float32, -bound, bound)

    out = self_attention_pallas(x, wq, wk, wv, bq, bk, bv)
    out = jax.block_until_ready(out)

    ref = jax.block_until_ready(self_attention_ref(x, wq, wk, wv, bq, bk, bv))
    # Tolerance slightly loosened vs. exact: pl.reciprocal(approx=True) uses
    # the EUP's approximate reciprocal for the softmax denominator.
    np.testing.assert_allclose(np.asarray(out), np.asarray(ref),
                               rtol=5e-3, atol=5e-3)

    print("KERNEL_OK")
</pallas_src>

<mosaic_0001>
module attributes {stable_mosaic.version = 11 : i64} {
  func.func @_self_attention_kernel(%arg0: i32, %arg1: memref<2x8x32xf32, #tpu.memory_space<vmem>>, %arg2: memref<32x96xf32, #tpu.memory_space<vmem>>, %arg3: memref<1x96xf32, #tpu.memory_space<vmem>>, %arg4: memref<2x8x32xf32, #tpu.memory_space<vmem>>) attributes {dimension_semantics = [#tpu.dimension_semantics<parallel>], iteration_bounds = array<i64: 1>, scalar_prefetch = 0 : i64, scratch_operands = 0 : i64, tpu.core_type = #tpu.core_type<tc>, window_params = [{transform_indices = @transform_0, window_bounds = array<i64: 2, 8, 32>}, {pipeline_mode = #tpu.pipeline_mode<synchronous>, transform_indices = @transform_1, window_bounds = array<i64: 32, 96>}, {pipeline_mode = #tpu.pipeline_mode<synchronous>, transform_indices = @transform_2, window_bounds = array<i64: 1, 96>}, {transform_indices = @transform_3, window_bounds = array<i64: 2, 8, 32>}]} {
    %c0 = arith.constant 0 : index
    %c0_0 = arith.constant 0 : index
    %c0_1 = arith.constant 0 : index
    %0 = vector.load %arg1[%c0, %c0_0, %c0_1] : memref<2x8x32xf32, #tpu.memory_space<vmem>>, vector<2x8x32xf32>
    %1 = vector.shape_cast %0 : vector<2x8x32xf32> to vector<16x32xf32>
    %c0_2 = arith.constant 0 : index
    %c0_3 = arith.constant 0 : index
    %2 = vector.load %arg2[%c0_2, %c0_3] : memref<32x96xf32, #tpu.memory_space<vmem>>, vector<32x96xf32>
    %cst = arith.constant dense<0.000000e+00> : vector<16x96xf32>
    %3 = tpu.matmul %1, %2, %cst {dimension_numbers = #tpu.dot_dimension_numbers<[1], [0], [0], [1], [0, 0, 1, 1], [], []>} : vector<16x32xf32>, vector<32x96xf32>, vector<16x96xf32> -> vector<16x96xf32>
    %c0_4 = arith.constant 0 : index
    %c0_5 = arith.constant 0 : index
    %4 = vector.load %arg3[%c0_4, %c0_5] : memref<1x96xf32, #tpu.memory_space<vmem>>, vector<1x96xf32>
    %5 = vector.broadcast %4 : vector<1x96xf32> to vector<16x96xf32>
    %6 = arith.addf %3, %5 : vector<16x96xf32>
    %7 = vector.shape_cast %6 : vector<16x96xf32> to vector<2x8x96xf32>
    %8 = vector.extract_strided_slice %7 {offsets = [0, 0, 0], sizes = [2, 8, 32], strides = [1, 1, 1]} : vector<2x8x96xf32> to vector<2x8x32xf32>
    %9 = vector.extract_strided_slice %7 {offsets = [0, 0, 32], sizes = [2, 8, 32], strides = [1, 1, 1]} : vector<2x8x96xf32> to vector<2x8x32xf32>
    %10 = vector.extract_strided_slice %7 {offsets = [0, 0, 64], sizes = [2, 8, 32], strides = [1, 1, 1]} : vector<2x8x96xf32> to vector<2x8x32xf32>
    %cst_6 = arith.constant dense<0.000000e+00> : vector<2x8x8xf32>
    %11 = tpu.matmul %8, %9, %cst_6 {dimension_numbers = #tpu.dot_dimension_numbers<[2], [2], [1], [1], [0, 0, 0, 1, 1, 1], [0], [0]>} : vector<2x8x32xf32>, vector<2x8x32xf32>, vector<2x8x8xf32> -> vector<2x8x8xf32>
    %cst_7 = arith.constant 0.176776692 : f32
    %12 = vector.broadcast %cst_7 : f32 to vector<2x8x8xf32>
    %13 = arith.mulf %11, %12 : vector<2x8x8xf32>
    %cst_8 = arith.constant dense<0xFF800000> : vector<2x8xf32>
    %14 = vector.multi_reduction <maximumf>, %13, %cst_8 [2] : vector<2x8x8xf32> to vector<2x8xf32>
    %15 = vector.shape_cast %14 : vector<2x8xf32> to vector<2x8x1xf32>
    %16 = vector.broadcast %15 : vector<2x8x1xf32> to vector<2x8x8xf32>
    %17 = arith.subf %13, %16 : vector<2x8x8xf32>
    %18 = math.exp %17 : vector<2x8x8xf32>
    %cst_9 = arith.constant dense<0.000000e+00> : vector<2x8xf32>
    %19 = vector.multi_reduction <add>, %18, %cst_9 [2] : vector<2x8x8xf32> to vector<2x8xf32>
    %20 = vector.shape_cast %19 : vector<2x8xf32> to vector<2x8x1xf32>
    %21 = tpu.reciprocal %20 {approx = true} : vector<2x8x1xf32> -> vector<2x8x1xf32>
    %22 = vector.broadcast %21 : vector<2x8x1xf32> to vector<2x8x8xf32>
    %23 = arith.mulf %18, %22 : vector<2x8x8xf32>
    %cst_10 = arith.constant dense<0.000000e+00> : vector<2x8x32xf32>
    %24 = tpu.matmul %23, %10, %cst_10 {dimension_numbers = #tpu.dot_dimension_numbers<[2], [1], [1], [2], [0, 0, 0, 1, 1, 2], [0], [0]>} : vector<2x8x8xf32>, vector<2x8x32xf32>, vector<2x8x32xf32> -> vector<2x8x32xf32>
    %c0_11 = arith.constant 0 : index
    %c0_12 = arith.constant 0 : index
    %c0_13 = arith.constant 0 : index
    %25 = vector.load %arg4[%c0_11, %c0_12, %c0_13] : memref<2x8x32xf32, #tpu.memory_space<vmem>>, vector<2x8x32xf32>
    tpu.vector_store %arg4[%c0_11, %c0_12, %c0_13], %24 {strides = array<i32>} : memref<2x8x32xf32, #tpu.memory_space<vmem>>, vector<2x8x32xf32>,
    return
  }
  func.func @transform_0(%arg0: i32) -> (i32, i32, i32) {
    %c0_i32 = arith.constant 0 : i32
    %c0_i32_0 = arith.constant 0 : i32
    %c0_i32_1 = arith.constant 0 : i32
    return %arg0, %c0_i32, %c0_i32_0 : i32, i32, i32
  }
  func.func @transform_1(%arg0: i32) -> (i32, i32) {
    %c0_i32 = arith.constant 0 : i32
    %c0_i32_0 = arith.constant 0 : i32
    %c0_i32_1 = arith.constant 0 : i32
    return %c0_i32, %c0_i32_0 : i32, i32
  }
  func.func @transform_2(%arg0: i32) -> (i32, i32) {
    %c0_i32 = arith.constant 0 : i32
    %c0_i32_0 = arith.constant 0 : i32
    %c0_i32_1 = arith.constant 0 : i32
    return %c0_i32, %c0_i32_0 : i32, i32
  }
  func.func @transform_3(%arg0: i32) -> (i32, i32, i32) {
    %c0_i32 = arith.constant 0 : i32
    %c0_i32_0 = arith.constant 0 : i32
    %c0_i32_1 = arith.constant 0 : i32
    return %arg0, %c0_i32, %c0_i32_0 : i32, i32, i32
  }
}

</mosaic_0001>

<bundles_post_ra>
// kernel: tpu_custom_call.1
= control target key start
LH: loop header
LB: loop body
LE: loop exit
PB: predicated region body
PF: predicated region fallthrough
CT: control target
= control target key end

     0   :  { %8 = vsyncpa [#allocation3], 0  ;;  %s404_s0 = inlined_call_operand.hbm [shape: f32[2,8,32], index: 0, kind: input, shape index: {}]   ;;  %s405_s1 = inlined_call_operand.hbm [shape: f32[32,96], index: 1, kind: input, shape index: {}]   ;;  %s406_s2 = inlined_call_operand.vmem [shape: f32[1,96], index: 2, kind: input, shape index: {}]   ;;  %s407_s3 = inlined_call_operand.hbm [shape: f32[2,8,32], index: 3, kind: output, shape index: {}]  }
   0x1   :  { %9 = vsyncpa [#allocation6], 0 }
   0x2   :  { %10 = vsyncpa [#allocation4], 0  ;;  %s15_s14 = sshll.u32 %s404_s0, 4  ;;  %s342_s15 = smov [#allocation2]   ;;  %s16_s14 = int_to_ptr.hbm [resolvable:$true] %s15_s14 }
   0x3   :  { %s17_s16 = sshll.u32 %s342_s15, 4  ;;  %s28_s19 = sshll.u32 %s405_s1, 4  ;;  %s18_s16 = int_to_ptr.vmem [resolvable:$true] %s17_s16  ;;  %s29_s19 = int_to_ptr.hbm [resolvable:$true] %s28_s19 }
   0x4   :  { %s343_s20 = smov 128   ;;  %s344_s21 = smov 8  }
   0x5   :  { %23 = dma.hbm_to_vmem [thread:$0]  %s16_s14, 256, %s18_s16, [#allocation3], %s343_s20, %s343_s20, %s344_s21  }
   0x6   :  { %s345_s22 = smov [#allocation5]  }
   0x7   :  { %s30_s23 = sshll.u32 %s345_s22, 4  ;;  %s31_s23 = int_to_ptr.vmem [resolvable:$true] %s30_s23 }
   0x8   :  { %36 = dma.hbm_to_vmem [thread:$0]  %s29_s19, 512, %s31_s23, [#allocation6], %s343_s20, %s343_s20, %s344_s21  }
   0x9   :  { %336 = dma.done.wait [#allocation3], 256  }
   0xa   :  { %337 = vsyncadd [#allocation3], 4294967040 }
   0xb   :  { %338 = dma.done.wait [#allocation6], 512  }
   0xc   :  { %339 = vsyncadd [#allocation6], 4294966784  ;;  %v52_v0 = vld [vmem:[#allocation5 + $0x18] sm:$0xff]  ;;  %v51_v1 = vld [vmem:[#allocation5 + $0x10] sm:$0xff]  ;;  %vm57_vm0 = vcmask 261120   ;;  %s346_s24 = smov 96  }
   0xd   :  { %76 = vmatpush.msra.mxu0 %v52_v0  ;;  %v50_v2 = vld [vmem:[#allocation5 + $0x8] sm:$0xff]  ;;  %v49_v3 = vld [vmem:[#allocation5] sm:$0xff]  ;;  %v47_v4 = vld [vmem:[#allocation2] sm:$0xff]  ;;  %s347_s25 = smov 64   ;;  %vm143_vm1 = vcmask 64512   ;;  %s226_s29 = sshll.u32 %s407_s3, 4  ;;  %s227_s29 = int_to_ptr.hbm [resolvable:$true] %s226_s29 }
   0xe   :  { %v48_v5 = vld [vmem:[#allocation2 + $0x8] sm:$0xff]  ;;  %v255_v6 = vld [vmem:[%s406_s2] ss:$0 sm:$0xff]  ;;  %s348_s2 = smov [#allocation7]  }
   0xf   :  { %77 = vmatpush.msra.mxu0 %v51_v1  ;;  %s224_s26 = sshll.u32 %s348_s2, 4  ;;  %s225_s26 = int_to_ptr.vmem [resolvable:$true] %s224_s26 }
  0x11   :  { %78 = vmatpush.msra.mxu0 %v50_v2 }
  0x13   :  { %79 = vmatpush.msra.mxu0 %v49_v3 }
  0x14   :  { %240 = vmatmul.msk.f32.vlgmr.msra.gmra.mxu0 %vm57_vm0, %v47_v4 }
  0x1c   :  { %241 = vmatmul.msk.f32.gmra.mxu0 %vm57_vm0, %v48_v5 }
  0x91   :  { %v81_v7 = vpop.f32.mrf.mxu0 }
  0x92   :  { %v82_v8 = vadd.f32 %v255_v6, %v81_v7 }
  0x94   :  { %88 = vrot.lane.b32.xlu0 %v82_v8, %s346_s24 }
  0x99   :  { %v84_v9 = vpop.f32.mrf.mxu0 }
  0x9a   :  { %v85_v10 = vadd.f32 %v255_v6, %v84_v9 }
  0x9c   :  { %115 = vrot.lane.b32.xlu0 %v85_v10, %s346_s24 }
  0xa4   :  { %166 = vrot.lane.b32.xlu0 %v82_v8, %s347_s25 }
 0x106   :  { %v89_v11 = vpop.permute.xlu0 %88 }
 0x107   :  { %242 = vmatpush.xpose.msk.msra.mxu1 %vm57_vm0, %v89_v11 }
 0x10a   :  { %243 = vmatmul.msk.f32.vlgmr.msra.gmra.mxu1 %vm57_vm0, %v82_v8 }
 0x10e   :  { %v116_v12 = vpop.permute.xlu0 %115 }
 0x10f   :  { %244 = vmatpush.xpose.msk.msra.mxu2 %vm57_vm0, %v116_v12 }
 0x112   :  { %245 = vmatmul.msk.f32.vlgmr.msra.gmra.mxu2 %vm57_vm0, %v85_v10 }
 0x116   :  { %v167_v13 = vpop.permute.xlu0 %166 }
 0x117   :  { %187 = vmatpush.msra.mxu3 %v167_v13 }
 0x187   :  { %v111_v14 = vpop.f32.mrf.mxu1 }
 0x188   :  { %v141_v15 = vmul.f32 0.17677669, %v111_v14 }
 0x18a   :  { %v144_v16 = vsel %vm143_vm1, %v141_v15, -inf }
 0x18b   :  { %145 = vmax.xlane.f32.xlu1 %v144_v16 }
 0x195   :  { %v138_v17 = vpop.f32.mrf.mxu2 }
 0x196   :  { %v142_v18 = vmul.f32 0.17677669, %v138_v17 }
 0x198   :  { %v147_v19 = vsel %vm143_vm1, %v142_v18, -inf }
 0x199   :  { %148 = vmax.xlane.f32.xlu1 %v147_v19 }
 0x1b2   :  { %192 = vrot.lane.b32.xlu1 %v85_v10, %s347_s25 }
 0x1fe   :  { %v146_v20 = vpop.xlane.xlu1 %145 }
 0x1ff   :  { %v150_v21 = vsub.f32 %v141_v15, %v146_v20 }
 0x201   :  { %v152_v22 = vmul.f32 1.442695, %v150_v21 }
 0x203   :  { %256 = vpow2.f32 %v152_v22 }
 0x209   :  { %v257_v23 = vpop.eup %256 }
 0x20a   :  { %v156_v24 = vsel %vm143_vm1, %v257_v23, 0.0 }
 0x20b   :  { %157 = vadd.xlane.f32.xlu2 %v156_v24 }
 0x20c   :  { %v149_v25 = vpop.xlane.xlu1 %148 }
 0x20d   :  { %v151_v26 = vsub.f32 %v142_v18, %v149_v25 }
 0x20f   :  { %v154_v27 = vmul.f32 1.442695, %v151_v26 }
 0x211   :  { %258 = vpow2.f32 %v154_v27 }
 0x217   :  { %v259_v28 = vpop.eup %258 }
 0x218   :  { %v159_v29 = vsel %vm143_vm1, %v259_v28, 0.0 }
 0x219   :  { %160 = vadd.xlane.f32.xlu2 %v159_v29 }
 0x224   :  { %v193_v30 = vpop.permute.xlu1 %192 }
 0x225   :  { %213 = vmatpush.msrb.mxu3 %v193_v30 }
 0x27e   :  { %v158_v31 = vpop.xlane.xlu2 %157 }
 0x27f   :  { %260 = vrcp.f32 %v158_v31 }
 0x285   :  { %v261_v32 = vpop.eup %260 }
 0x286   :  { %v164_v33 = vmul.f32 %v261_v32, %v257_v23 }
 0x288   :  { %246 = vmatmul.msk.f32.vlgmr.msra.gmra.mxu3 %vm143_vm1, %v164_v33 }
 0x28c   :  { %v161_v34 = vpop.xlane.xlu2 %160 }
 0x28d   :  { %262 = vrcp.f32 %v161_v34 }
 0x293   :  { %v263_v35 = vpop.eup %262 }
 0x294   :  { %v165_v36 = vmul.f32 %v263_v35, %v259_v28 }
 0x296   :  { %247 = vmatmul.msk.f32.vlgmr.msrb.gmra.mxu3 %vm143_vm1, %v165_v36 }
 0x30b   :  { %v189_v37 = vpop.f32.mrf.mxu3 }
 0x30c   :  { %218 = vst.msk [vmem:[#allocation7] sm:$0xff] %vm57_vm0, %v189_v37 }
 0x319   :  { %v215_v38 = vpop.f32.mrf.mxu3 }
 0x31a   :  { %219 = vst.msk [vmem:[#allocation7 + $0x8] sm:$0xff] %vm57_vm0, %v215_v38 }
 0x31b   :  { %232 = dma.vmem_to_hbm [thread:$0]  %s225_s26, 256, %s227_s29, [#allocation4], %s343_s20, %s343_s20, %s344_s21  }
 0x31c   :  { %340 = dma.done.wait [#allocation4], 256  }
 0x31d   :  { %341 = vsyncadd [#allocation4], 4294967040 }
 0x31e   :  { %237 = vsyncpa [#allocation3], 1 }
 0x31f   :  { %238 = vsyncpa [#allocation6], 1 }
 0x320   :  { %239 = vsyncpa [#allocation4], 1 }

</bundles_post_ra>
